<compile_context>
chip_gen: v7x
topology: tpu7x:2x2x1
jax: 0.10.0
libtpu: 0.0.40
codegen_flags: <defaults>
</compile_context>

<pallas_src>
import jax
import jax.numpy as jnp
from jax.experimental import pallas as pl
from jax.experimental.pallas import tpu as pltpu

GALEX_FEAT, PS_FEAT, UNWISE_FEAT, EBV_FEAT = 1532, 770, 770, 2
# Lane-aligned branch widths. PS/UNWISE pad 770 -> 1024 (not 896) so the
# backbone matmuls keep a 2-way "parallel" output axis (v7x megacore) while
# still using 512-wide column tiles (512 KB bf16 weight DMA per step).
GALEX_PAD, PS_PAD, UNWISE_PAD = 1536, 1024, 1024
CAT_PAD = PS_PAD + UNWISE_PAD + GALEX_PAD          # 3584
K_ALIGN = 512


def round_up(n, m):
    return ((n + m - 1) // m) * m


def _largest_divisor_tile(dim, candidates):
    for c in candidates:
        if dim % c == 0:
            return c
    return dim


# ----------------------------------------------------------------------------
# Backbone stub: Linear + fused bias/ReLU/bf16-cast epilogue.
# Grid: (output-width "parallel", K-reduction "arbitrary"); f32 accumulator.
# ----------------------------------------------------------------------------
def _linear_relu_kernel(x_ref, w_ref, b_ref, o_ref, acc_ref):
    k = pl.program_id(1)

    @pl.when(k == 0)
    def _():
        acc_ref[...] = jnp.zeros_like(acc_ref)

    acc_ref[...] += jnp.dot(x_ref[...], w_ref[...],
                            preferred_element_type=jnp.float32)

    @pl.when(k == pl.num_programs(1) - 1)
    def _():
        # Fused bias + branch ReLU + bf16 cast (relu(concat) == concat(relu)):
        # the fusion head consumes ready-to-MXU bf16 activations.
        o_ref[...] = jnp.maximum(acc_ref[...] + b_ref[...], 0.0).astype(o_ref.dtype)


def pallas_linear_relu(x_bf16, w_bf16, b_f32):
    """x: (B_pad, K_pad) bf16, w: (K_pad, F_pad) bf16, b: (1, F_pad) f32.
    Returns relu(x @ w + b) as (B_pad, F_pad) bf16."""
    b_pad, k_pad = x_bf16.shape
    kw, f_pad = w_bf16.shape
    assert kw == k_pad
    tk = min(512, k_pad)
    assert k_pad % tk == 0
    if f_pad % 512 == 0 and f_pad // 512 >= 2:
        tf = 512      # >=2 "parallel" tiles for v7x + 512 KB bf16 weight DMA/step
    else:
        tf = _largest_divisor_tile(f_pad, (1024, 512, 256, 128))
    grid = (f_pad // tf, k_pad // tk)

    cost = pl.CostEstimate(
        flops=2 * b_pad * k_pad * f_pad,
        transcendentals=0,
        bytes_accessed=k_pad * f_pad * 2 + b_pad * (k_pad + f_pad) * 2 + f_pad * 4,
    )
    return pl.pallas_call(
        _linear_relu_kernel,
        out_shape=jax.ShapeDtypeStruct((b_pad, f_pad), jnp.bfloat16),
        grid=grid,
        in_specs=[
            pl.BlockSpec((b_pad, tk), lambda f, k: (0, k)),
            pl.BlockSpec((tk, tf), lambda f, k: (k, f)),
            pl.BlockSpec((1, tf), lambda f, k: (0, f)),
        ],
        out_specs=pl.BlockSpec((b_pad, tf), lambda f, k: (0, f)),
        scratch_shapes=[pltpu.VMEM((b_pad, tf), jnp.float32)],
        compiler_params=pltpu.CompilerParams(
            dimension_semantics=("parallel", "arbitrary")),
        cost_estimate=cost,
    )(x_bf16, w_bf16, b_f32)


# ----------------------------------------------------------------------------
# Fused late-fusion head.
# Grid: (2-way width half-split "parallel" for v7x megacore,
#        fc0-width tiles "arbitrary" = fc1 reduction axis).
# Emits (2, B_pad, NC_pad) partial sums; the two slabs + fc1 bias are added
# outside (trivial). fc1 partials accumulate directly in the resident o_ref.
# ----------------------------------------------------------------------------
def _fusion_head_kernel(cat_ref, ebv_ref, w0c_ref, w0e_ref, b0_ref, w1_ref,
                        o_ref):
    j = pl.program_id(1)

    @pl.when(j == 0)
    def _():
        o_ref[...] = jnp.zeros_like(o_ref)

    # fc0 column slice: one K=3584 MXU pass over the pre-rectified bf16 concat.
    h = jnp.dot(cat_ref[...], w0c_ref[...], preferred_element_type=jnp.float32)
    # ebv (K=2, not rectified): VPU broadcast-FMA instead of a padded MXU pass.
    ebv = ebv_ref[...]
    h += ebv[:, 0:1] * w0e_ref[0:1, :] + ebv[:, 1:2] * w0e_ref[1:2, :]
    h = jnp.maximum(h + b0_ref[...], 0.0)                     # fc0 bias + ReLU
    # fc1 partial sum, accumulated directly in the f32 output block.
    o_ref[...] += jnp.dot(h.astype(jnp.bfloat16), w1_ref[...],
                          preferred_element_type=jnp.float32)


def fusion_head_partials(cat_bf16, ebv_f32, w0_cat, w0_ebv, b0, w1):
    b_pad = cat_bf16.shape[0]
    width = w0_cat.shape[1]
    nc_pad = w1.shape[1]
    assert width % 256 == 0, "fc0 width must be a multiple of 256"
    width_half = width // 2
    tn = _largest_divisor_tile(width_half, (1024, 512, 256, 128))
    nsteps = width_half // tn
    grid = (2, nsteps)

    col = lambda hh, j: (0, hh * nsteps + j)   # column-block index in full width

    cost = pl.CostEstimate(
        flops=2 * b_pad * CAT_PAD * width + 2 * b_pad * width * nc_pad,
        transcendentals=0,
        bytes_accessed=(CAT_PAD * width + width * nc_pad) * 2
        + b_pad * CAT_PAD * 2 + width * 12 + 2 * b_pad * nc_pad * 4,
    )
    return pl.pallas_call(
        _fusion_head_kernel,
        out_shape=jax.ShapeDtypeStruct((2, b_pad, nc_pad), jnp.float32),
        grid=grid,
        in_specs=[
            pl.BlockSpec((b_pad, CAT_PAD), lambda hh, j: (0, 0)),   # invariant
            pl.BlockSpec((b_pad, EBV_FEAT), lambda hh, j: (0, 0)),  # invariant
            pl.BlockSpec((CAT_PAD, tn), col),
            pl.BlockSpec((EBV_FEAT, tn), col),
            pl.BlockSpec((1, tn), col),
            pl.BlockSpec((tn, nc_pad), lambda hh, j: (hh * nsteps + j, 0)),
        ],
        out_specs=pl.BlockSpec((None, b_pad, nc_pad), lambda hh, j: (hh, 0, 0)),
        compiler_params=pltpu.CompilerParams(
            dimension_semantics=("parallel", "arbitrary")),
        cost_estimate=cost,
    )(cat_bf16, ebv_f32, w0_cat, w0_ebv, b0, w1)


# ----------------------------------------------------------------------------
# Parameter init (PyTorch Linear default) and one-time prep (split/pad/cast).
# ----------------------------------------------------------------------------
def init_linear(key, fan_in, fan_out):
    kw, kb = jax.random.split(key)
    bound = 1.0 / jnp.sqrt(fan_in)
    w = jax.random.uniform(kw, (fan_in, fan_out), jnp.float32, -bound, bound)
    b = jax.random.uniform(kb, (fan_out,), jnp.float32, -bound, bound)
    return w, b


def prepare_params(raw):
    """Done ONCE outside the forward: split + row-pad + concat w0 into one
    (3584, width) matrix matching the [ps|unwise|galex] activation layout,
    pad fc1 columns, cast MXU operands to bf16 (biases / ebv rows stay f32).
    # TODO(synk): optional int8 (v5e/v6e) or fp8 (v7x) weight quantization,
    # gated via pltpu.get_tpu_info(), would halve the weight DMA again.
    """
    def prep_backbone(w, b, feat_pad):
        k, f = w.shape
        k_pad = round_up(k, K_ALIGN)
        w_p = jnp.zeros((k_pad, feat_pad), jnp.float32).at[:k, :f].set(w)
        b_p = jnp.zeros((1, feat_pad), jnp.float32).at[0, :f].set(b)
        return w_p.astype(jnp.bfloat16), b_p

    w0, b0 = raw["fc0"]                       # (3074, width), (width,)
    w1, b1 = raw["fc1"]                       # (width, num_classes)
    width = w0.shape[1]
    num_classes = w1.shape[1]
    nc_pad = round_up(num_classes, 128)

    s0, s1 = PS_FEAT, PS_FEAT + UNWISE_FEAT
    s2 = s1 + GALEX_FEAT
    w0_cat = jnp.zeros((CAT_PAD, width), jnp.float32)
    w0_cat = w0_cat.at[:PS_FEAT].set(w0[:s0])
    w0_cat = w0_cat.at[PS_PAD:PS_PAD + UNWISE_FEAT].set(w0[s0:s1])
    w0_cat = w0_cat.at[PS_PAD + UNWISE_PAD:
                       PS_PAD + UNWISE_PAD + GALEX_FEAT].set(w0[s1:s2])

    return {
        "galex": prep_backbone(*raw["galex"], GALEX_PAD),
        "ps": prep_backbone(*raw["ps"], PS_PAD),
        "unwise": prep_backbone(*raw["unwise"], UNWISE_PAD),
        "w0_cat": w0_cat.astype(jnp.bfloat16),
        "w0_ebv": w0[s2:],                                    # (2, width) f32
        "b0": b0.reshape(1, width),
        "w1": jnp.zeros((width, nc_pad), jnp.float32)
                 .at[:, :num_classes].set(w1).astype(jnp.bfloat16),
        "b1": jnp.zeros((1, nc_pad), jnp.float32).at[0, :num_classes].set(b1),
        "num_classes": num_classes,
    }


def late_fusion_forward(params, x_galex, x_ps, x_unwise, ebv):
    B = x_galex.shape[0]
    # >=16 padded rows: bf16 sublane packing is 16; rounding is cheap (HBM-bound).
    b_pad = round_up(max(B, 16), 8)

    def flat_pad(x, k_pad):
        x2 = x.reshape(B, -1)
        x2 = jnp.pad(x2, ((0, b_pad - B), (0, k_pad - x2.shape[1])))
        # NOTE: bf16 input cast -> parity with the f32 module is at the
        # bf16-matmul level (well within the 5e-2 tolerance checked below).
        return x2.astype(jnp.bfloat16)

    gx_w, gx_b = params["galex"]
    ps_w, ps_b = params["ps"]
    uw_w, uw_b = params["unwise"]

    # TODO(synk): the real model_galex / model_ps / model_unwise are arbitrary
    # external backbones (e.g. ResNets); stubbed here as flatten + Linear.
    f_gx = pallas_linear_relu(flat_pad(x_galex, gx_w.shape[0]), gx_w, gx_b)
    f_ps = pallas_linear_relu(flat_pad(x_ps, ps_w.shape[0]), ps_w, ps_b)
    f_uw = pallas_linear_relu(flat_pad(x_unwise, uw_w.shape[0]), uw_w, uw_b)

    # Tiny (b_pad, 3584) bf16 concat done once outside the kernels; padded
    # columns are exactly zero (zero weight/bias columns + ReLU).
    cat = jnp.concatenate([f_ps, f_uw, f_gx], axis=1)
    ebv_p = jnp.pad(ebv, ((0, b_pad - B), (0, 0)))

    partials = fusion_head_partials(cat, ebv_p, params["w0_cat"],
                                    params["w0_ebv"], params["b0"],
                                    params["w1"])
    out_pad = partials[0] + partials[1] + params["b1"]
    return out_pad[:B, :params["num_classes"]]


def reference_forward(raw, x_galex, x_ps, x_unwise, ebv):
    """Pure-JAX f32 reference, identical math to the PyTorch module."""
    B = x_galex.shape[0]
    f_gx = x_galex.reshape(B, -1) @ raw["galex"][0] + raw["galex"][1]
    f_ps = x_ps.reshape(B, -1) @ raw["ps"][0] + raw["ps"][1]
    f_uw = x_unwise.reshape(B, -1) @ raw["unwise"][0] + raw["unwise"][1]
    x = jnp.maximum(jnp.concatenate([f_ps, f_uw, f_gx], axis=1), 0.0)
    x = jnp.concatenate([x, ebv], axis=1)
    x = jnp.maximum(x @ raw["fc0"][0] + raw["fc0"][1], 0.0)
    return x @ raw["fc1"][0] + raw["fc1"][1]


if __name__ == "__main__":
    # Small demo shapes (feature widths 1532/770/770/2 are fixed by the module).
    B = 2
    H = W = 16
    C_GALEX, C_PS, C_UNWISE = 2, 5, 2        # NUV/FUV, grizy, W1/W2
    WIDTH = 256                               # module default is 2048; small demo
    NUM_CLASSES = 200

    root = jax.random.PRNGKey(0)
    k_in, k_gx, k_ps, k_uw, k_f0, k_f1 = jax.random.split(root, 6)
    ki_gx, ki_ps, ki_uw, ki_ebv = jax.random.split(k_in, 4)

    x_galex = jax.random.normal(ki_gx, (B, C_GALEX, H, W), jnp.float32)
    x_ps = jax.random.normal(ki_ps, (B, C_PS, H, W), jnp.float32)
    x_unwise = jax.random.normal(ki_uw, (B, C_UNWISE, H, W), jnp.float32)
    ebv = jax.random.uniform(ki_ebv, (B, EBV_FEAT), jnp.float32)

    raw = {
        "galex": init_linear(k_gx, C_GALEX * H * W, GALEX_FEAT),
        "ps": init_linear(k_ps, C_PS * H * W, PS_FEAT),
        "unwise": init_linear(k_uw, C_UNWISE * H * W, UNWISE_FEAT),
        "fc0": init_linear(k_f0, PS_FEAT + UNWISE_FEAT + GALEX_FEAT + EBV_FEAT,
                           WIDTH),
        "fc1": init_linear(k_f1, WIDTH, NUM_CLASSES),
    }
    params = prepare_params(raw)

    out = late_fusion_forward(params, x_galex, x_ps, x_unwise, ebv)
    out = jax.block_until_ready(out)

    assert out.shape == (B, NUM_CLASSES), out.shape
    assert bool(jnp.all(jnp.isfinite(out)))

    # bf16-matmul vs f32 reference tolerance check.
    ref = reference_forward(raw, x_galex, x_ps, x_unwise, ebv)
    rel_err = float(jnp.max(jnp.abs(out - ref)) / (jnp.max(jnp.abs(ref)) + 1e-6))
    assert rel_err < 5e-2, rel_err

    print("KERNEL_OK")
</pallas_src>

<mosaic_0001>
module attributes {stable_mosaic.version = 11 : i64} {
  func.func @_linear_relu_kernel(%arg0: i32, %arg1: i32, %arg2: memref<16x512xbf16, #tpu.memory_space<vmem>>, %arg3: memref<512x512xbf16, #tpu.memory_space<vmem>>, %arg4: memref<1x512xf32, #tpu.memory_space<vmem>>, %arg5: memref<16x512xbf16, #tpu.memory_space<vmem>>, %arg6: memref<16x512xf32, #tpu.memory_space<vmem>>) attributes {dimension_semantics = [#tpu.dimension_semantics<parallel>, #tpu.dimension_semantics<arbitrary>], iteration_bounds = array<i64: 3, 1>, scalar_prefetch = 0 : i64, scratch_operands = 1 : i64, tpu.core_type = #tpu.core_type<tc>, window_params = [{transform_indices = @transform_0, window_bounds = array<i64: 16, 512>}, {transform_indices = @transform_1, window_bounds = array<i64: 512, 512>}, {transform_indices = @transform_2, window_bounds = array<i64: 1, 512>}, {transform_indices = @transform_3, window_bounds = array<i64: 16, 512>}]} {
    %c0_i32 = arith.constant 0 : i32
    %0 = arith.cmpi eq, %arg1, %c0_i32 : i32
    %1 = arith.extui %0 : i1 to i32
    %c0_i32_0 = arith.constant 0 : i32
    %2 = arith.cmpi ne, %1, %c0_i32_0 : i32
    scf.if %2 {
      %cst_10 = arith.constant 0.000000e+00 : f32
      %12 = vector.broadcast %cst_10 : f32 to vector<16x512xf32>
      %c0_11 = arith.constant 0 : index
      %c0_12 = arith.constant 0 : index
      %13 = vector.load %arg6[%c0_11, %c0_12] : memref<16x512xf32, #tpu.memory_space<vmem>>, vector<16x512xf32>
      tpu.vector_store %arg6[%c0_11, %c0_12], %12 {strides = array<i32>} : memref<16x512xf32, #tpu.memory_space<vmem>>, vector<16x512xf32>,
    } else {
    }
    %c0 = arith.constant 0 : index
    %c0_1 = arith.constant 0 : index
    %3 = vector.load %arg6[%c0, %c0_1] : memref<16x512xf32, #tpu.memory_space<vmem>>, vector<16x512xf32>
    %c0_2 = arith.constant 0 : index
    %c0_3 = arith.constant 0 : index
    %4 = vector.load %arg2[%c0_2, %c0_3] : memref<16x512xbf16, #tpu.memory_space<vmem>>, vector<16x512xbf16>
    %c0_4 = arith.constant 0 : index
    %c0_5 = arith.constant 0 : index
    %5 = vector.load %arg3[%c0_4, %c0_5] : memref<512x512xbf16, #tpu.memory_space<vmem>>, vector<512x512xbf16>
    %cst = arith.constant dense<0.000000e+00> : vector<16x512xf32>
    %6 = tpu.matmul %4, %5, %cst {dimension_numbers = #tpu.dot_dimension_numbers<[1], [0], [0], [1], [0, 0, 1, 1], [], []>} : vector<16x512xbf16>, vector<512x512xbf16>, vector<16x512xf32> -> vector<16x512xf32>
    %7 = arith.addf %3, %6 : vector<16x512xf32>
    %c0_6 = arith.constant 0 : index
    %c0_7 = arith.constant 0 : index
    %8 = vector.load %arg6[%c0_6, %c0_7] : memref<16x512xf32, #tpu.memory_space<vmem>>, vector<16x512xf32>
    tpu.vector_store %arg6[%c0_6, %c0_7], %7 {strides = array<i32>} : memref<16x512xf32, #tpu.memory_space<vmem>>, vector<16x512xf32>,
    %c0_i32_8 = arith.constant 0 : i32
    %9 = arith.cmpi eq, %arg1, %c0_i32_8 : i32
    %10 = arith.extui %9 : i1 to i32
    %c0_i32_9 = arith.constant 0 : i32
    %11 = arith.cmpi ne, %10, %c0_i32_9 : i32
    scf.if %11 {
      %c0_10 = arith.constant 0 : index
      %c0_11 = arith.constant 0 : index
      %12 = vector.load %arg6[%c0_10, %c0_11] : memref<16x512xf32, #tpu.memory_space<vmem>>, vector<16x512xf32>
      %c0_12 = arith.constant 0 : index
      %c0_13 = arith.constant 0 : index
      %13 = vector.load %arg4[%c0_12, %c0_13] : memref<1x512xf32, #tpu.memory_space<vmem>>, vector<1x512xf32>
      %14 = vector.broadcast %13 : vector<1x512xf32> to vector<16x512xf32>
      %15 = arith.addf %12, %14 : vector<16x512xf32>
      %cst_14 = arith.constant 0.000000e+00 : f32
      %16 = vector.broadcast %cst_14 : f32 to vector<16x512xf32>
      %17 = arith.maximumf %15, %16 : vector<16x512xf32>
      %18 = arith.truncf %17 : vector<16x512xf32> to vector<16x512xbf16>
      %c0_15 = arith.constant 0 : index
      %c0_16 = arith.constant 0 : index
      %19 = vector.load %arg5[%c0_15, %c0_16] : memref<16x512xbf16, #tpu.memory_space<vmem>>, vector<16x512xbf16>
      tpu.vector_store %arg5[%c0_15, %c0_16], %18 {strides = array<i32>} : memref<16x512xbf16, #tpu.memory_space<vmem>>, vector<16x512xbf16>,
    } else {
    }
    return
  }
  func.func @transform_0(%arg0: i32, %arg1: i32) -> (i32, i32) {
    %c0_i32 = arith.constant 0 : i32
    %c0_i32_0 = arith.constant 0 : i32
    return %c0_i32, %arg1 : i32, i32
  }
  func.func @transform_1(%arg0: i32, %arg1: i32) -> (i32, i32) {
    %c0_i32 = arith.constant 0 : i32
    return %arg1, %arg0 : i32, i32
  }
  func.func @transform_2(%arg0: i32, %arg1: i32) -> (i32, i32) {
    %c0_i32 = arith.constant 0 : i32
    %c0_i32_0 = arith.constant 0 : i32
    return %c0_i32, %arg0 : i32, i32
  }
  func.func @transform_3(%arg0: i32, %arg1: i32) -> (i32, i32) {
    %c0_i32 = arith.constant 0 : i32
    %c0_i32_0 = arith.constant 0 : i32
    return %c0_i32, %arg0 : i32, i32
  }
}

</mosaic_0001>

<bundles_post_ra>
// kernel: tpu_custom_call.1
= control target key start
LH: loop header
LB: loop body
LE: loop exit
PB: predicated region body
PF: predicated region fallthrough
CT: control target
= control target key end

     0   :  { %s2530_s0 = inlined_call_operand.hbm [shape: bf16[16,512], index: 0, kind: input, shape index: {}]   ;;  %s2531_s1 = inlined_call_operand.hbm [shape: bf16[512,1536], index: 1, kind: input, shape index: {}]   ;;  %s2532_s2 = inlined_call_operand.hbm [shape: f32[1,1536], index: 2, kind: input, shape index: {}]   ;;  %s2533_s3 = inlined_call_operand.hbm [shape: bf16[16,1536], index: 3, kind: output, shape index: {}]  }
   0x1   :  { %2541 = sst [smem:[#allocation13_spill]] %s2531_s1 }
   0x2   :  { %8 = vsyncpa [#allocation4], 0 }
   0x3   :  { %9 = vsyncpa [#allocation7], 0 }
   0x4   :  { %11 = vsyncpa [#allocation7 + $0x1], 0 }
   0x5   :  { %12 = vsyncpa [#allocation5], 0 }
   0x6   :  { %14 = vsyncpa [#allocation5 + $0x1], 0  ;;  %s2138_s12 = smov 0   ;;  %s2140_s13 = smov 0  }
   0x7   :  { %s2142_s14 = smov 0   ;;  %s2144_s15 = smov 0  }
   0x8   :  { %s2146_s16 = smov 0   ;;  %s2148_s17 = smov 0  }
   0x9 LB: > { %s32_s18 = sadd.s32 1, %s2102_s16  ;;  %s67_s19 = sadd.s32 1, %s2094_s14  ;;  %s2106_s17 = sphi %s2148_s17, %s20_s17   ;;  %s2102_s16 = sphi %s2146_s16, %s2563_s16   ;;  %s2098_s15 = sphi %s2144_s15, %s2562_s15   ;;  %s2094_s14 = sphi %s2142_s14, %s2561_s14   ;;  %s2090_s13 = sphi %s2140_s13, %s2560_s13   ;;  %s2086_s12 = sphi %s2138_s12, %s2559_s12  }
   0xa   : > { %p34_p0 = scmp.ge.s32.totalorder %s32_s18, 3  ;;  %p74_p1 = scmp.ne.s32.totalorder %s2094_s14, %s2090_s13 }
   0xb   : > { %p75_p2 = scmp.eq.s32.totalorder %s2106_s17, 0  ;;  %p1676_p5 = scmp.lt.s32.totalorder %s2106_s17, 3 }
   0xc   : > { %s2565_s18 = smov (%p34_p0, %s32_s18), 0  ;;  %s172_s22 = sand.u32 1, %s2106_s17  }
   0xd   : > { %p2178_p3 = por %p75_p2, %p74_p1  ;;  %s63_s21 = ssub.s32 %s2102_s16, %s2565_s18 }
   0xe   : > { %p65_p4 = scmp.eq.s32.totalorder %s63_s21, 0  ;;  %s174_s23 = sand.u32 1, %s2094_s14  }
   0xf   : > { %s1483_s25 = sshll.u32 %s174_s23, 10  ;;  %s1635_s26 = sshll.u32 %s2102_s16, 8 }
  0x10   : > { %s2188_s24 = scalar_select %p65_p4, %s2094_s14, %s67_s19  }
  0x11   : > { %s2543_s1 = sld [smem:[#allocation13_spill]]  ;;  %s176_s30 = scalar_lea.vmem [#allocation6], %s1483_s25 }
  0x12   : > { %s186_s4 = sshll.u32 %s176_s30, 4  ;;  %p2202_p6 = pnand %p1676_p5, %p2178_p3  ;;  %s2198_s4 = int_to_ptr.vmem [resolvable:$true] %s186_s4 }
  0x13   : > { %s2206_s6 = scalar_lea.sflag [#allocation7], %s172_s22 }
  0x14   : > { %p1934_p8 = pneg %p2202_p6 }
  0x17   : > { %s2196_s29 = scalar_lea.hbm %s2543_s1, %s1635_s26  ;;  %s1937_s10 = scalar_lea.hbm %s2543_s1, 49152 }
  0x18   : > { %s1932_s7 = scalar_lea.hbm %s2196_s29, 16384  ;;  %p1938_p11 = scmp.lt.u32.totalorder %s2196_s29, %s2543_s1 }
  0x19   : > { %p1933_p7 = scmp.ne.s32.totalorder %s2196_s29, %s1932_s7  ;;  %p1939_p12 = scmp.lt.u32.totalorder %s1937_s10, %s1932_s7 }
  0x1a   : > { %p1941_p0 = scmp.lt.u32.totalorder %s1932_s7, %s2196_s29 }
  0x1b   : > { %p1935_p9 = pnand %p1934_p8, %p1933_p7  ;;  %p1940_p13 = por %p1939_p12, %p1938_p11 }
  0x1d   : > { %p1936_p10 = pneg %p1935_p9  ;;  %p1942_p2 = por %p1941_p0, %p1940_p13 }
  0x1f   : > { %p1943_p3 = pnand %p1942_p2, %p1936_p10 }
  0x21   : > { %1946 = shalt.err (!%p1943_p3)
}
  0x22   : > { %s1947_s20 = scalar_lea.vmem %s2198_s4, 16384  ;;  %s2108_s21 = smov [#allocation6]  }
  0x23   : > { %p1948_p4 = scmp.ne.s32.totalorder %s2198_s4, %s1947_s20  ;;  %s1952_s22 = sshll.u32 %s2108_s21, 4  ;;  %s1953_s22 = int_to_ptr.vmem [resolvable:$false] %s1952_s22 }
  0x24   : > { %s1954_s25 = scalar_lea.vmem %s1953_s22, 32768  ;;  %p1955_p9 = scmp.lt.s32.totalorder %s2198_s4, %s1953_s22 }
  0x25   : > { %p1950_p5 = pnand %p1948_p4, %p1934_p8  ;;  %p1956_p11 = scmp.lt.s32.totalorder %s1954_s25, %s1947_s20 }
  0x27   : > { %p1951_p7 = pneg %p1950_p5  ;;  %p1957_p12 = por %p1956_p11, %p1955_p9 }
  0x29   : > { %p1958_p13 = pnand %p1957_p12, %p1951_p7 }
  0x2b   : > { %1961 = shalt.err (!%p1958_p13)
}
  0x2c   : > { %s2109_s26 = smov 768   ;;  %s2534_s27 = smov 256  }
  0x2d   : > { %s2535_s28 = smov 16   ;;  %s2237_s30 = sadd.s32 4294967295, %s2106_s17  }
  0x2e   : > { %1667 = dma.hbm_to_vmem [thread:$0]  (!%p2202_p6), %s2196_s29, 16384, %s2198_s4, %s2206_s6, %s2109_s26, %s2534_s27, %s2535_s28  }
  0x2f   : > { %s1479_s7 = sadd.s32 4294967294, %s2106_s17   ;;  %p80_p10 = scmp.ne.s32.totalorder %s2090_s13, %s2086_s12 }
  0x30   : > { %p2536_p0 = scmp.eq.s32.totalorder %s2237_s30, 0  ;;  %p130_p2 = scmp.eq.s32.totalorder %s2237_s30, 2 }
  0x31   : > { %p136_p3 = scmp.eq.s32.totalorder %s1479_s7, 2  ;;  %p1480_p5 = scmp.ge.s32.totalorder %s2106_s17, 1 }
  0x32   : > { %p2246_p4 = por %p2536_p0, %p80_p10  ;;  %p2254_p7 = por %p130_p2, %p74_p1 }
  0x33   : > { %p2258_p9 = por %p136_p3, %p80_p10  ;;  %p143_p11 = scmp.lt.s32.totalorder %s2106_s17, 4 }
  0x34   : > { %s2545_s8 = scalar_select %p2246_p4, 1, 0 }
  0x35   : > { %s2546_s29 = scalar_select %p2254_p7, 1, 0 }
  0x36   : > { %s2547_s4 = scalar_select %p2258_p9, 1, 0 }
  0x37   : > { %s1486_s9 = sshll.u32 %s174_s23, 2  ;;  %p2265_p12 = pnand %p1480_p5, %p143_p11 }
  0x38   : > { %s2112_s11 = smov [#allocation3]   ;;  %s1636_s20 = sshll.u32 %s2102_s16, 6 }
  0x39   : > { %s2548_s10 = scalar_select %p2265_p12, 1, 0 }
  0x3a   : > { %s158_s19 = sshll.u32 %s2112_s11, 4  ;;  %p1660_p1 = pneg %p2265_p12  ;;  %s2269_s19 = int_to_ptr.vmem [resolvable:$true] %s158_s19 }
  0x3b   : > { %s2277_s25 = scalar_lea.hbm %s2532_s2, %s1636_s20  ;;  %s200_s23 = scalar_lea.vmem [#allocation8], %s1486_s9 }
  0x3c   : > { %s208_s26 = sshll.u32 %s200_s23, 4  ;;  %p2281_p13 = pnand %p1660_p1, %p2536_p0  ;;  %s209_s26 = int_to_ptr.vmem [resolvable:$true] %s208_s26 }
  0x3d   : > { %s1962_s11 = scalar_lea.hbm %s2277_s25, 64  ;;  %s1967_s22 = scalar_lea.hbm %s2532_s2, 192 }
  0x3e   : > { %s2549_s7 = scalar_select %p2281_p13, 1, 0 }
  0x3f   : > { %p1963_p10 = scmp.ne.s32.totalorder %s2277_s25, %s1962_s11  ;;  %p1968_p5 = scmp.lt.u32.totalorder %s2277_s25, %s2532_s2 }
  0x40   : > { %p1969_p11 = scmp.lt.u32.totalorder %s1967_s22, %s1962_s11  ;;  %p1971_p0 = scmp.lt.u32.totalorder %s1962_s11, %s2277_s25 }
  0x41   : > { %p1965_p2 = pnand %p1963_p10, %p1934_p8 }
  0x42   : > { %p1970_p1 = por %p1969_p11, %p1968_p5 }
  0x43   : > { %p1966_p3 = pneg %p1965_p2 }
  0x44   : > { %p1972_p9 = por %p1971_p0, %p1970_p1 }
  0x46   : > { %p1973_p7 = pnand %p1972_p9, %p1966_p3 }
  0x48   : > { %1976 = shalt.err (!%p1973_p7)
}
  0x49   : > { %s1977_s9 = scalar_lea.vmem %s209_s26, 64  ;;  %s2113_s23 = smov [#allocation8]  }
  0x4a   : > { %p1978_p4 = scmp.ne.s32.totalorder %s209_s26, %s1977_s9  ;;  %s1982_s20 = sshll.u32 %s2113_s23, 4  ;;  %s1983_s20 = int_to_ptr.vmem [resolvable:$false] %s1982_s20 }
  0x4b   : > { %s1984_s21 = scalar_lea.vmem %s1983_s20, 128  ;;  %p1985_p12 = scmp.lt.s32.totalorder %s209_s26, %s1983_s20 }
  0x4c   : > { %p1980_p10 = pnand %p1978_p4, %p1934_p8  ;;  %p1986_p13 = scmp.lt.s32.totalorder %s1984_s21, %s1977_s9 }
  0x4e   : > { %p1981_p2 = pneg %p1980_p10  ;;  %p1987_p5 = por %p1986_p13, %p1985_p12 }
  0x50   : > { %p1988_p11 = pnand %p1987_p5, %p1981_p2 }
  0x52   : > { %1991 = shalt.err (!%p1988_p11)
}
  0x53   : > { %1670 = dma.hbm_to_vmem [thread:$0]  (!%p2202_p6), %s2277_s25, 64, %s209_s26, %s2206_s6  }
  0x54   : > { %s1992_s11 = scalar_lea.hbm %s2530_s0, 512  ;;  %p2550_p0 = scmp.ne.s32.totalorder %s2549_s7, 0 }
  0x55   : > { %p1993_p8 = scmp.ne.s32.totalorder %s2530_s0, %s1992_s11  ;;  %p1999_p12 = scmp.lt.u32.totalorder %s1992_s11, %s2530_s0 }
  0x56   : > { %p1994_p4 = pneg %p2550_p0 }
  0x58   : > { %p1995_p7 = pnand %p1994_p4, %p1993_p8 }
  0x5a   : > { %p1996_p9 = pneg %p1995_p7 }
  0x5c   : > { %p2001_p13 = pnand %p1999_p12, %p1996_p9 }
  0x5e   : > { %2004 = shalt.err (!%p2001_p13)
}
  0x5f   : > { %s2005_s5 = scalar_lea.vmem %s2269_s19, 512  ;;  %p2013_p10 = scmp.lt.s32.totalorder %s2269_s19, %s2269_s19 }
  0x60   : > { %p2006_p6 = scmp.ne.s32.totalorder %s2269_s19, %s2005_s5  ;;  %p2014_p2 = scmp.lt.s32.totalorder %s2005_s5, %s2005_s5 }
  0x62   : > { %p2008_p3 = pnand %p2006_p6, %p1994_p4  ;;  %p2015_p5 = por %p2014_p2, %p2013_p10 }
  0x64   : > { %p2009_p1 = pneg %p2008_p3 }
  0x66   : > { %p2016_p11 = pnand %p2015_p5, %p2009_p1 }
  0x68   : > { %2019 = shalt.err (!%p2016_p11)
}
  0x69   : > { %s2551_s1 = smov 16   ;;  %s2552_s6 = smov 256  }
  0x6a   : > { %1663 = dma.hbm_to_vmem [thread:$0]  (!%p2550_p0), %s2530_s0, 512, %s2269_s19, [#allocation4], %s2552_s6, %s2552_s6, %s2551_s1  }
  0x6b   : > { %p2553_p8 = scmp.ne.s32.totalorder %s2548_s10, 0 }
  0x6c   : > { %p2554_p4 = scmp.eq.s32.totalorder (!%p2553_p8), %s2237_s30, 0 }
  0x6d   : > { %217 = sbr.rel (%p2553_p8) target bundleno = 488 (0x1e8), region = 32 }
  0x74   : > { %2073 = dma.done.wait (%p2554_p4), [#allocation4], 512   ;;  %p2555_p7 = pmov %p2554_p4 }
  0x75   : > { %s223_s7 = sand.u32 1, %s2237_s30   ;;  %s2337_s20 = sand.u32 1, %s2090_s13  }
  0x76   : > { %2075 = vsyncadd (%p2555_p7), [#allocation4], 4294966784  ;;  %s1491_s21 = sshll.u32 %s2337_s20, 10  ;;  %s224_s27 = scalar_lea.sflag [#allocation7], %s223_s7 }
  0x77   : > { %s2340_s28 = scalar_lea.vmem [#allocation6], %s1491_s21  ;;  %p2556_p0 = scmp.ne.s32.totalorder %s2545_s8, 0 }
  0x79   : > { %2077 = dma.done.wait (%p2556_p0), %s224_s27, 16448  }
  0x7a   : > { %2079 = vsyncadd (%p2556_p0), %s224_s27, 4294950848  ;;  %v1734_v0 = vld [vmem:[%s2340_s28 + $0x4] ss:$16 sps:$4 sm:$0xff]   ;;  %v1736_v1 = vld [vmem:[%s2340_s28 + $0xc] ss:$16 sps:$4 sm:$0xff]   ;;  %s1492_s30 = sshll.u32 %s2337_s20, 2 }
  0x7b   : > { %1081 = vmatprep.subr.bf16.mxu0 %v1734_v0  ;;  %v1738_v2 = vld [vmem:[%s2340_s28] ss:$16 sps:$4 sm:$0xff]   ;;  %v1739_v3 = vld [vmem:[%s2340_s28 + $0x8] ss:$16 sps:$4 sm:$0xff]   ;;  %1167 = vmatprep.subr.bf16.mxu1 %v1736_v1  ;;  %v1740_v4 = vld [vmem:[%s2340_s28 + $0x24] ss:$16 sps:$4 sm:$0xff]  }
  0x7c   : > { %1082 = vmatpush1.bf16.msra.mxu0 %v1738_v2  ;;  %1168 = vmatpush1.bf16.msra.mxu1 %v1739_v3  ;;  %v1742_v5 = vld [vmem:[%s2340_s28 + $0x2c] ss:$16 sps:$4 sm:$0xff]   ;;  %v1744_v6 = vld [vmem:[%s2340_s28 + $0x20] ss:$16 sps:$4 sm:$0xff]   ;;  %v1745_v7 = vld [vmem:[%s2340_s28 + $0x28] ss:$16 sps:$4 sm:$0xff]  }
  0x7d   : > { %1083 = vmatprep.subr.bf16.mxu0 %v1740_v4  ;;  %1169 = vmatprep.subr.bf16.mxu1 %v1742_v5  ;;  %v1746_v8 = vld [vmem:[%s2340_s28 + $0x44] ss:$16 sps:$4 sm:$0xff]   ;;  %v1748_v9 = vld [vmem:[%s2340_s28 + $0x4c] ss:$16 sps:$4 sm:$0xff]   ;;  %v1750_v10 = vld [vmem:[%s2340_s28 + $0x40] ss:$16 sps:$4 sm:$0xff]  }
  0x7e   : > { %v1751_v11 = vld [vmem:[%s2340_s28 + $0x48] ss:$16 sps:$4 sm:$0xff]   ;;  %v1752_v12 = vld [vmem:[%s2340_s28 + $0x64] ss:$16 sps:$4 sm:$0xff]   ;;  %v1754_v13 = vld [vmem:[%s2340_s28 + $0x6c] ss:$16 sps:$4 sm:$0xff]  }
  0x7f   : > { %v1756_v14 = vld [vmem:[%s2340_s28 + $0x60] ss:$16 sps:$4 sm:$0xff]   ;;  %v1757_v15 = vld [vmem:[%s2340_s28 + $0x68] ss:$16 sps:$4 sm:$0xff]   ;;  %v1758_v16 = vld [vmem:[%s2340_s28 + $0x84] ss:$16 sps:$4 sm:$0xff]  }
  0x80   : > { %1084 = vmatpush1.bf16.msra.mxu0 %v1744_v6  ;;  %1170 = vmatpush1.bf16.msra.mxu1 %v1745_v7  ;;  %v1760_v17 = vld [vmem:[%s2340_s28 + $0x8c] ss:$16 sps:$4 sm:$0xff]   ;;  %v1762_v18 = vld [vmem:[%s2340_s28 + $0x80] ss:$16 sps:$4 sm:$0xff]   ;;  %v1763_v19 = vld [vmem:[%s2340_s28 + $0x88] ss:$16 sps:$4 sm:$0xff]  }
  0x81   : > { %1085 = vmatprep.subr.bf16.mxu0 %v1746_v8  ;;  %1171 = vmatprep.subr.bf16.mxu1 %v1748_v9  ;;  %v1764_v20 = vld [vmem:[%s2340_s28 + $0xa4] ss:$16 sps:$4 sm:$0xff]   ;;  %v1766_v21 = vld [vmem:[%s2340_s28 + $0xac] ss:$16 sps:$4 sm:$0xff]   ;;  %v1768_v22 = vld [vmem:[%s2340_s28 + $0xa0] ss:$16 sps:$4 sm:$0xff]  }
  0x82   : > { %v1769_v23 = vld [vmem:[%s2340_s28 + $0xa8] ss:$16 sps:$4 sm:$0xff]   ;;  %v1770_v24 = vld [vmem:[%s2340_s28 + $0xc4] ss:$16 sps:$4 sm:$0xff]   ;;  %v1772_v25 = vld [vmem:[%s2340_s28 + $0xcc] ss:$16 sps:$4 sm:$0xff]  }
  0x83   : > { %v1774_v26 = vld [vmem:[%s2340_s28 + $0xc0] ss:$16 sps:$4 sm:$0xff]   ;;  %v1775_v27 = vld [vmem:[%s2340_s28 + $0xc8] ss:$16 sps:$4 sm:$0xff]   ;;  %v1776_v28 = vld [vmem:[%s2340_s28 + $0xe4] ss:$16 sps:$4 sm:$0xff]  }
  0x84   : > { %1086 = vmatpush1.bf16.msra.mxu0 %v1750_v10  ;;  %1172 = vmatpush1.bf16.msra.mxu1 %v1751_v11  ;;  %v1778_v29 = vld [vmem:[%s2340_s28 + $0xec] ss:$16 sps:$4 sm:$0xff]   ;;  %v1780_v30 = vld [vmem:[%s2340_s28 + $0xe0] ss:$16 sps:$4 sm:$0xff]   ;;  %v1781_v31 = vld [vmem:[%s2340_s28 + $0xe8] ss:$16 sps:$4 sm:$0xff]  }
  0x85   : > { %1087 = vmatprep.subr.bf16.mxu0 %v1752_v12  ;;  %1173 = vmatprep.subr.bf16.mxu1 %v1754_v13  ;;  %v1782_v32 = vld [vmem:[%s2340_s28 + $0x104] ss:$16 sps:$4 sm:$0xff]   ;;  %v1784_v33 = vld [vmem:[%s2340_s28 + $0x10c] ss:$16 sps:$4 sm:$0xff]   ;;  %v1786_v34 = vld [vmem:[%s2340_s28 + $0x100] ss:$16 sps:$4 sm:$0xff]  }
  0x86   : > { %v1787_v35 = vld [vmem:[%s2340_s28 + $0x108] ss:$16 sps:$4 sm:$0xff]   ;;  %v1788_v36 = vld [vmem:[%s2340_s28 + $0x124] ss:$16 sps:$4 sm:$0xff]   ;;  %v1790_v37 = vld [vmem:[%s2340_s28 + $0x12c] ss:$16 sps:$4 sm:$0xff]  }
  0x87   : > { %v1792_v38 = vld [vmem:[%s2340_s28 + $0x120] ss:$16 sps:$4 sm:$0xff]   ;;  %v1793_v39 = vld [vmem:[%s2340_s28 + $0x128] ss:$16 sps:$4 sm:$0xff]   ;;  %v1794_v40 = vld [vmem:[%s2340_s28 + $0x144] ss:$16 sps:$4 sm:$0xff]  }
  0x88   : > { %1088 = vmatpush1.bf16.msra.mxu0 %v1756_v14  ;;  %1174 = vmatpush1.bf16.msra.mxu1 %v1757_v15  ;;  %v1796_v41 = vld [vmem:[%s2340_s28 + $0x14c] ss:$16 sps:$4 sm:$0xff]   ;;  %v1798_v42 = vld [vmem:[%s2340_s28 + $0x140] ss:$16 sps:$4 sm:$0xff]   ;;  %v1799_v43 = vld [vmem:[%s2340_s28 + $0x148] ss:$16 sps:$4 sm:$0xff]  }
  0x89   : > { %1089 = vmatprep.subr.bf16.mxu0 %v1758_v16  ;;  %1175 = vmatprep.subr.bf16.mxu1 %v1760_v17  ;;  %v1800_v44 = vld [vmem:[%s2340_s28 + $0x164] ss:$16 sps:$4 sm:$0xff]   ;;  %v1802_v45 = vld [vmem:[%s2340_s28 + $0x16c] ss:$16 sps:$4 sm:$0xff]   ;;  %v1804_v46 = vld [vmem:[%s2340_s28 + $0x160] ss:$16 sps:$4 sm:$0xff]  }
  0x8a   : > { %v1805_v47 = vld [vmem:[%s2340_s28 + $0x168] ss:$16 sps:$4 sm:$0xff]   ;;  %v1832_v48 = vld [vmem:[#allocation3 + $0x4] ss:$16 sps:$4 sm:$0xff]   ;;  %v1808_v50 = vld [vmem:[%s2340_s28 + $0x18c] ss:$16 sps:$4 sm:$0xff]  }
  0x8b   : > { %v1806_v49 = vld [vmem:[%s2340_s28 + $0x184] ss:$16 sps:$4 sm:$0xff]   ;;  %1113 = vmatprep.mubr.bf16.mxu0 %v1832_v48  ;;  %1199 = vmatprep.mubr.bf16.mxu1 %v1832_v48  ;;  %v1810_v51 = vld [vmem:[%s2340_s28 + $0x180] ss:$16 sps:$4 sm:$0xff]   ;;  %v1811_v52 = vld [vmem:[%s2340_s28 + $0x188] ss:$16 sps:$4 sm:$0xff]  }
  0x8c   : > { %1090 = vmatpush1.bf16.msra.mxu0 %v1762_v18  ;;  %1176 = vmatpush1.bf16.msra.mxu1 %v1763_v19  ;;  %v1812_v53 = vld [vmem:[%s2340_s28 + $0x1a4] ss:$16 sps:$4 sm:$0xff]   ;;  %v1814_v54 = vld [vmem:[%s2340_s28 + $0x1ac] ss:$16 sps:$4 sm:$0xff]   ;;  %v1816_v55 = vld [vmem:[%s2340_s28 + $0x1a0] ss:$16 sps:$4 sm:$0xff]  }
  0x8d   : > { %1091 = vmatprep.subr.bf16.mxu0 %v1764_v20  ;;  %1177 = vmatprep.subr.bf16.mxu1 %v1766_v21  ;;  %v1817_v56 = vld [vmem:[%s2340_s28 + $0x1a8] ss:$16 sps:$4 sm:$0xff]   ;;  %v1818_v57 = vld [vmem:[%s2340_s28 + $0x1c4] ss:$16 sps:$4 sm:$0xff]   ;;  %v1820_v58 = vld [vmem:[%s2340_s28 + $0x1cc] ss:$16 sps:$4 sm:$0xff]  }
  0x8e   : > { %v1822_v59 = vld [vmem:[%s2340_s28 + $0x1c0] ss:$16 sps:$4 sm:$0xff]   ;;  %v1823_v60 = vld [vmem:[%s2340_s28 + $0x1c8] ss:$16 sps:$4 sm:$0xff]   ;;  %v1824_v61 = vld [vmem:[%s2340_s28 + $0x1e4] ss:$16 sps:$4 sm:$0xff]  }
  0x8f   : > { %v1826_v62 = vld [vmem:[%s2340_s28 + $0x1ec] ss:$16 sps:$4 sm:$0xff]   ;;  %v1828_v63 = vld [vmem:[%s2340_s28 + $0x1e0] ss:$16 sps:$4 sm:$0xff]   ;;  %v1829_v0 = vld [vmem:[%s2340_s28 + $0x1e8] ss:$16 sps:$4 sm:$0xff]  }
  0x90   : > { %1092 = vmatpush1.bf16.msra.mxu0 %v1768_v22  ;;  %1178 = vmatpush1.bf16.msra.mxu1 %v1769_v23  ;;  %v1835_v1 = vld [vmem:[%s2340_s28 + $0x204] ss:$16 sps:$4 sm:$0xff]   ;;  %v1838_v2 = vld [vmem:[%s2340_s28 + $0x20c] ss:$16 sps:$4 sm:$0xff]   ;;  %v1830_v3 = vld [vmem:[#allocation3] ss:$16 sps:$4 sm:$0xff]  }
  0x91   : > { %1093 = vmatprep.subr.bf16.mxu0 %v1770_v24  ;;  %1179 = vmatprep.subr.bf16.mxu1 %v1772_v25  ;;  %v1833_v4 = vld [vmem:[%s2340_s28 + $0x200] ss:$16 sps:$4 sm:$0xff]   ;;  %v1836_v5 = vld [vmem:[%s2340_s28 + $0x208] ss:$16 sps:$4 sm:$0xff]   ;;  %v1841_v6 = vld [vmem:[%s2340_s28 + $0x224] ss:$16 sps:$4 sm:$0xff]  }
  0x92   : > { %v1844_v7 = vld [vmem:[%s2340_s28 + $0x22c] ss:$16 sps:$4 sm:$0xff]   ;;  %v1839_v8 = vld [vmem:[%s2340_s28 + $0x220] ss:$16 sps:$4 sm:$0xff]   ;;  %v1842_v9 = vld [vmem:[%s2340_s28 + $0x228] ss:$16 sps:$4 sm:$0xff]  }
  0x93   : > { %v1847_v10 = vld [vmem:[%s2340_s28 + $0x244] ss:$16 sps:$4 sm:$0xff]   ;;  %v1850_v11 = vld [vmem:[%s2340_s28 + $0x24c] ss:$16 sps:$4 sm:$0xff]   ;;  %v1845_v12 = vld [vmem:[%s2340_s28 + $0x240] ss:$16 sps:$4 sm:$0xff]  }
  0x94   : > { %1094 = vmatpush1.bf16.msra.mxu0 %v1774_v26  ;;  %1180 = vmatpush1.bf16.msra.mxu1 %v1775_v27  ;;  %v1848_v13 = vld [vmem:[%s2340_s28 + $0x248] ss:$16 sps:$4 sm:$0xff]   ;;  %v1853_v14 = vld [vmem:[%s2340_s28 + $0x264] ss:$16 sps:$4 sm:$0xff]   ;;  %v1856_v15 = vld [vmem:[%s2340_s28 + $0x26c] ss:$16 sps:$4 sm:$0xff]  }
  0x95   : > { %1095 = vmatprep.subr.bf16.mxu0 %v1776_v28  ;;  %1181 = vmatprep.subr.bf16.mxu1 %v1778_v29  ;;  %v1851_v16 = vld [vmem:[%s2340_s28 + $0x260] ss:$16 sps:$4 sm:$0xff]   ;;  %v1854_v17 = vld [vmem:[%s2340_s28 + $0x268] ss:$16 sps:$4 sm:$0xff]   ;;  %v1859_v18 = vld [vmem:[%s2340_s28 + $0x284] ss:$16 sps:$4 sm:$0xff]  }
  0x96   : > { %v1862_v19 = vld [vmem:[%s2340_s28 + $0x28c] ss:$16 sps:$4 sm:$0xff]   ;;  %v1857_v20 = vld [vmem:[%s2340_s28 + $0x280] ss:$16 sps:$4 sm:$0xff]   ;;  %v1860_v21 = vld [vmem:[%s2340_s28 + $0x288] ss:$16 sps:$4 sm:$0xff]  }
  0x97   : > { %v1865_v22 = vld [vmem:[%s2340_s28 + $0x2a4] ss:$16 sps:$4 sm:$0xff]   ;;  %v1868_v23 = vld [vmem:[%s2340_s28 + $0x2ac] ss:$16 sps:$4 sm:$0xff]   ;;  %v1863_v24 = vld [vmem:[%s2340_s28 + $0x2a0] ss:$16 sps:$4 sm:$0xff]  }
  0x98   : > { %1096 = vmatpush1.bf16.msra.mxu0 %v1780_v30  ;;  %1182 = vmatpush1.bf16.msra.mxu1 %v1781_v31  ;;  %v1866_v25 = vld [vmem:[%s2340_s28 + $0x2a8] ss:$16 sps:$4 sm:$0xff]   ;;  %v1871_v26 = vld [vmem:[%s2340_s28 + $0x2c4] ss:$16 sps:$4 sm:$0xff]   ;;  %v1874_v27 = vld [vmem:[%s2340_s28 + $0x2cc] ss:$16 sps:$4 sm:$0xff]  }
  0x99   : > { %1097 = vmatprep.subr.bf16.mxu0 %v1782_v32  ;;  %1183 = vmatprep.subr.bf16.mxu1 %v1784_v33  ;;  %v1931_v28 = vld [vmem:[#allocation3 + $0xc] ss:$16 sps:$4 sm:$0xff]   ;;  %v1869_v29 = vld [vmem:[%s2340_s28 + $0x2c0] ss:$16 sps:$4 sm:$0xff]   ;;  %v1872_v30 = vld [vmem:[%s2340_s28 + $0x2c8] ss:$16 sps:$4 sm:$0xff]  }
  0x9a   : > { %v1877_v31 = vld [vmem:[%s2340_s28 + $0x2e4] ss:$16 sps:$4 sm:$0xff]   ;;  %v1880_v32 = vld [vmem:[%s2340_s28 + $0x2ec] ss:$16 sps:$4 sm:$0xff]   ;;  %v1875_v33 = vld [vmem:[%s2340_s28 + $0x2e0] ss:$16 sps:$4 sm:$0xff]  }
  0x9b   : > { %v1904_v48 = vld [vmem:[%s2340_s28 + $0x36c] ss:$16 sps:$4 sm:$0xff]   ;;  %s236_s8 = scalar_lea.vmem [#allocation8], %s1492_s30  ;;  %s1493_s10 = sshll.u32 %s2337_s20, 5 }
  0x9c   : > { %1098 = vmatpush1.bf16.msra.mxu0 %v1786_v34  ;;  %1184 = vmatpush1.bf16.msra.mxu1 %v1787_v35  ;;  %v1878_v34 = vld [vmem:[%s2340_s28 + $0x2e8] ss:$16 sps:$4 sm:$0xff]   ;;  %v1883_v35 = vld [vmem:[%s2340_s28 + $0x304] ss:$16 sps:$4 sm:$0xff]   ;;  %s263_s19 = scalar_lea.vmem [#allocation9], %s1493_s10  ;;  %s1641_s22 = sshll.u32 %s2098_s15, 8 }
  0x9d   : > { %1099 = vmatprep.subr.bf16.mxu0 %v1788_v36  ;;  %1185 = vmatprep.subr.bf16.mxu1 %v1790_v37  ;;  %v1886_v36 = vld [vmem:[%s2340_s28 + $0x30c] ss:$16 sps:$4 sm:$0xff]   ;;  %v1881_v37 = vld [vmem:[%s2340_s28 + $0x300] ss:$16 sps:$4 sm:$0xff]   ;;  %s1360_s11 = sshll.u32 %s263_s19, 4  ;;  %s2482_s5 = scalar_lea.hbm %s2533_s3, %s1641_s22  ;;  %s2477_s11 = int_to_ptr.vmem [resolvable:$true] %s1360_s11 }
  0x9e   : > { %s1347_s15 = scalar_lea.sflag [#allocation5], %s2337_s20  ;;  %s2020_s1 = scalar_lea.vmem %s2477_s11, 512 }
  0x9f   : > { %p2021_p9 = scmp.ne.s32.totalorder %s2477_s11, %s2020_s1  ;;  %p2557_p12 = scmp.ne.s32.totalorder %s2546_s29, 0 }
  0xa0   : > { %1100 = vmatpush1.bf16.msra.mxu0 %v1792_v38  ;;  %1186 = vmatpush1.bf16.msra.mxu1 %v1793_v39  ;;  %v1884_v38 = vld [vmem:[%s2340_s28 + $0x308] ss:$16 sps:$4 sm:$0xff]   ;;  %v1889_v39 = vld [vmem:[%s2340_s28 + $0x324] ss:$16 sps:$4 sm:$0xff]   ;;  %s2114_s6 = smov [#allocation9]  }
  0xa1   : > { %1101 = vmatprep.subr.bf16.mxu0 %v1794_v40  ;;  %1187 = vmatprep.subr.bf16.mxu1 %v1796_v41  ;;  %v1892_v40 = vld [vmem:[%s2340_s28 + $0x32c] ss:$16 sps:$4 sm:$0xff]   ;;  %v1887_v41 = vld [vmem:[%s2340_s28 + $0x320] ss:$16 sps:$4 sm:$0xff]   ;;  %p2022_p13 = pnand %p2021_p9, %p2557_p12  ;;  %s2024_s25 = sshll.u32 %s2114_s6, 4  ;;  %s2025_s25 = int_to_ptr.vmem [resolvable:$false] %s2024_s25 }
  0xa2   : > { %s2026_s26 = scalar_lea.vmem %s2025_s25, 1024  ;;  %p2027_p3 = scmp.lt.s32.totalorder %s2477_s11, %s2025_s25 }
  0xa3   : > { %p2023_p6 = pneg %p2022_p13  ;;  %p2028_p1 = scmp.lt.s32.totalorder %s2026_s26, %s2020_s1 }
  0xa4   : > { %1102 = vmatpush1.bf16.msra.mxu0 %v1798_v42  ;;  %1188 = vmatpush1.bf16.msra.mxu1 %v1799_v43  ;;  %v1890_v42 = vld [vmem:[%s2340_s28 + $0x328] ss:$16 sps:$4 sm:$0xff]   ;;  %v1895_v43 = vld [vmem:[%s2340_s28 + $0x344] ss:$16 sps:$4 sm:$0xff]  }
  0xa5   : > { %1103 = vmatprep.subr.bf16.mxu0 %v1800_v44  ;;  %1189 = vmatprep.subr.bf16.mxu1 %v1802_v45  ;;  %v1898_v44 = vld [vmem:[%s2340_s28 + $0x34c] ss:$16 sps:$4 sm:$0xff]   ;;  %v1893_v45 = vld [vmem:[%s2340_s28 + $0x340] ss:$16 sps:$4 sm:$0xff]   ;;  %p2029_p10 = por %p2028_p1, %p2027_p3 }
  0xa7   : > { %p2030_p2 = pnand %p2029_p10, %p2023_p6 }
  0xa8   : > { %1104 = vmatpush1.bf16.msra.mxu0 %v1804_v46  ;;  %1190 = vmatpush1.bf16.msra.mxu1 %v1805_v47  ;;  %v1896_v46 = vld [vmem:[%s2340_s28 + $0x348] ss:$16 sps:$4 sm:$0xff]   ;;  %v1901_v47 = vld [vmem:[%s2340_s28 + $0x364] ss:$16 sps:$4 sm:$0xff]  }
  0xa9   : > { %1105 = vmatprep.subr.bf16.mxu0 %v1806_v49  ;;  %1191 = vmatprep.subr.bf16.mxu1 %v1808_v50  ;;  %v1899_v49 = vld [vmem:[%s2340_s28 + $0x360] ss:$16 sps:$4 sm:$0xff]   ;;  %v1902_v50 = vld [vmem:[%s2340_s28 + $0x368] ss:$16 sps:$4 sm:$0xff]  }
  0xac   : > { %1106 = vmatpush1.bf16.msra.mxu0 %v1810_v51  ;;  %1192 = vmatpush1.bf16.msra.mxu1 %v1811_v52  ;;  %v1907_v51 = vld [vmem:[%s2340_s28 + $0x384] ss:$16 sps:$4 sm:$0xff]   ;;  %v1910_v52 = vld [vmem:[%s2340_s28 + $0x38c] ss:$16 sps:$4 sm:$0xff]  }
  0xad   : > { %1107 = vmatprep.subr.bf16.mxu0 %v1812_v53  ;;  %1193 = vmatprep.subr.bf16.mxu1 %v1814_v54  ;;  %v1905_v53 = vld [vmem:[%s2340_s28 + $0x380] ss:$16 sps:$4 sm:$0xff]   ;;  %v1908_v54 = vld [vmem:[%s2340_s28 + $0x388] ss:$16 sps:$4 sm:$0xff]  }
  0xb0   : > { %1108 = vmatpush1.bf16.msra.mxu0 %v1816_v55  ;;  %1194 = vmatpush1.bf16.msra.mxu1 %v1817_v56  ;;  %v1913_v55 = vld [vmem:[%s2340_s28 + $0x3a4] ss:$16 sps:$4 sm:$0xff]   ;;  %v1916_v56 = vld [vmem:[%s2340_s28 + $0x3ac] ss:$16 sps:$4 sm:$0xff]  }
  0xb1   : > { %1109 = vmatprep.subr.bf16.mxu0 %v1818_v57  ;;  %1195 = vmatprep.subr.bf16.mxu1 %v1820_v58  ;;  %v1911_v57 = vld [vmem:[%s2340_s28 + $0x3a0] ss:$16 sps:$4 sm:$0xff]   ;;  %v1914_v58 = vld [vmem:[%s2340_s28 + $0x3a8] ss:$16 sps:$4 sm:$0xff]  }
  0xb4   : > { %1110 = vmatpush1.bf16.msra.mxu0 %v1822_v59  ;;  %1196 = vmatpush1.bf16.msra.mxu1 %v1823_v60  ;;  %v1919_v59 = vld [vmem:[%s2340_s28 + $0x3c4] ss:$16 sps:$4 sm:$0xff]   ;;  %v1922_v60 = vld [vmem:[%s2340_s28 + $0x3cc] ss:$16 sps:$4 sm:$0xff]  }
  0xb5   : > { %1111 = vmatprep.subr.bf16.mxu0 %v1824_v61  ;;  %1197 = vmatprep.subr.bf16.mxu1 %v1826_v62  ;;  %v1917_v61 = vld [vmem:[%s2340_s28 + $0x3c0] ss:$16 sps:$4 sm:$0xff]   ;;  %v1920_v62 = vld [vmem:[%s2340_s28 + $0x3c8] ss:$16 sps:$4 sm:$0xff]  }
  0xb8   : > { %1112 = vmatpush1.bf16.msra.mxu0 %v1828_v63  ;;  %1198 = vmatpush1.bf16.msra.mxu1 %v1829_v0  ;;  %v1925_v63 = vld [vmem:[%s2340_s28 + $0x3e4] ss:$16 sps:$4 sm:$0xff]   ;;  %v1928_v0 = vld [vmem:[%s2340_s28 + $0x3ec] ss:$16 sps:$4 sm:$0xff]  }
  0xb9   : > { %1124 = vmatprep.subr.bf16.mxu0 %v1835_v1  ;;  %1210 = vmatprep.subr.bf16.mxu1 %v1838_v2  ;;  %v1923_v1 = vld [vmem:[%s2340_s28 + $0x3e0] ss:$16 sps:$4 sm:$0xff]   ;;  %v1926_v2 = vld [vmem:[%s2340_s28 + $0x3e8] ss:$16 sps:$4 sm:$0xff]  }
  0xbb   : > { %1114 = vmatmul.mubr.bf16.vlgmr.msra.gmra.mrb[0].mxu0 %v1830_v3  ;;  %1200 = vmatmul.mubr.bf16.vlgmr.msra.gmra.mrb[0].mxu1 %v1830_v3  ;;  %v1929_v3 = vld [vmem:[#allocation3 + $0x8] ss:$16 sps:$4 sm:$0xff]  }
  0xbc   : > { %1125 = vmatpush1.bf16.msra.mxu0 %v1833_v4  ;;  %1211 = vmatpush1.bf16.msra.mxu1 %v1836_v5  ;;  %v1282_v4 = vlaneseq }
  0xbd   : > { %1126 = vmatprep.subr.bf16.mxu0 %v1841_v6  ;;  %1212 = vmatprep.subr.bf16.mxu1 %v1844_v7 }
  0xbe   : > { %1156 = vmatprep.mubr.bf16.mxu0 %v1931_v28  ;;  %1242 = vmatprep.mubr.bf16.mxu1 %v1931_v28  ;;  %v1283_v5 = vshrl.u32 %v1282_v4, 7 }
  0xc0   : > { %1127 = vmatpush1.bf16.msra.mxu0 %v1839_v8  ;;  %1213 = vmatpush1.bf16.msra.mxu1 %v1842_v9  ;;  %v1284_v6 = vsub.s32 0, %v1283_v5  ;;  %v1292_v7 = vsub.s32 2, %v1283_v5  ;;  %v1280_v8 = vld [vmem:[%s236_s8] sm:$0xf]  ;;  %v1288_v9 = vsub.s32 1, %v1283_v5 }
  0xc1   : > { %1128 = vmatprep.subr.bf16.mxu0 %v1847_v10  ;;  %1214 = vmatprep.subr.bf16.mxu1 %v1850_v11  ;;  %v1296_v10 = vsub.s32 3, %v1283_v5 }
  0xc2   : > { %v1285_v11 = vrot.slane %v1280_v8, %v1284_v6 }
  0xc4   : > { %1129 = vmatpush1.bf16.msra.mxu0 %v1845_v12  ;;  %1215 = vmatpush1.bf16.msra.mxu1 %v1848_v13  ;;  %v1293_v12 = vrot.slane %v1280_v8, %v1292_v7  ;;  %v1289_v13 = vrot.slane %v1280_v8, %v1288_v9 }
  0xc5   : > { %1130 = vmatprep.subr.bf16.mxu0 %v1853_v14  ;;  %1216 = vmatprep.subr.bf16.mxu1 %v1856_v15  ;;  %v1297_v14 = vrot.slane %v1280_v8, %v1296_v10 }
  0xc8   : > { %1131 = vmatpush1.bf16.msra.mxu0 %v1851_v16  ;;  %1217 = vmatpush1.bf16.msra.mxu1 %v1854_v17 }
  0xc9   : > { %1132 = vmatprep.subr.bf16.mxu0 %v1859_v18  ;;  %1218 = vmatprep.subr.bf16.mxu1 %v1862_v19 }
  0xcc   : > { %1133 = vmatpush1.bf16.msra.mxu0 %v1857_v20  ;;  %1219 = vmatpush1.bf16.msra.mxu1 %v1860_v21 }
  0xcd   : > { %1134 = vmatprep.subr.bf16.mxu0 %v1865_v22  ;;  %1220 = vmatprep.subr.bf16.mxu1 %v1868_v23 }
  0xd0   : > { %1135 = vmatpush1.bf16.msra.mxu0 %v1863_v24  ;;  %1221 = vmatpush1.bf16.msra.mxu1 %v1866_v25 }
  0xd1   : > { %1136 = vmatprep.subr.bf16.mxu0 %v1871_v26  ;;  %1222 = vmatprep.subr.bf16.mxu1 %v1874_v27 }
  0xd4   : > { %1137 = vmatpush1.bf16.msra.mxu0 %v1869_v29  ;;  %1223 = vmatpush1.bf16.msra.mxu1 %v1872_v30 }
  0xd5   : > { %1138 = vmatprep.subr.bf16.mxu0 %v1877_v31  ;;  %1224 = vmatprep.subr.bf16.mxu1 %v1880_v32 }
  0xd8   : > { %1139 = vmatpush1.bf16.msra.mxu0 %v1875_v33  ;;  %1225 = vmatpush1.bf16.msra.mxu1 %v1878_v34 }
  0xd9   : > { %1140 = vmatprep.subr.bf16.mxu0 %v1883_v35  ;;  %1226 = vmatprep.subr.bf16.mxu1 %v1886_v36 }
  0xdc   : > { %1141 = vmatpush1.bf16.msra.mxu0 %v1881_v37  ;;  %1227 = vmatpush1.bf16.msra.mxu1 %v1884_v38 }
  0xdd   : > { %1142 = vmatprep.subr.bf16.mxu0 %v1889_v39  ;;  %1228 = vmatprep.subr.bf16.mxu1 %v1892_v40 }
  0xe0   : > { %1143 = vmatpush1.bf16.msra.mxu0 %v1887_v41  ;;  %1229 = vmatpush1.bf16.msra.mxu1 %v1890_v42 }
  0xe1   : > { %1144 = vmatprep.subr.bf16.mxu0 %v1895_v43  ;;  %1230 = vmatprep.subr.bf16.mxu1 %v1898_v44 }
  0xe4   : > { %1145 = vmatpush1.bf16.msra.mxu0 %v1893_v45  ;;  %1231 = vmatpush1.bf16.msra.mxu1 %v1896_v46 }
  0xe5   : > { %1146 = vmatprep.subr.bf16.mxu0 %v1901_v47  ;;  %1232 = vmatprep.subr.bf16.mxu1 %v1904_v48 }
  0xe8   : > { %1147 = vmatpush1.bf16.msra.mxu0 %v1899_v49  ;;  %1233 = vmatpush1.bf16.msra.mxu1 %v1902_v50 }
  0xe9   : > { %1148 = vmatprep.subr.bf16.mxu0 %v1907_v51  ;;  %1234 = vmatprep.subr.bf16.mxu1 %v1910_v52 }
  0xec   : > { %1149 = vmatpush1.bf16.msra.mxu0 %v1905_v53  ;;  %1235 = vmatpush1.bf16.msra.mxu1 %v1908_v54 }
  0xed   : > { %1150 = vmatprep.subr.bf16.mxu0 %v1913_v55  ;;  %1236 = vmatprep.subr.bf16.mxu1 %v1916_v56 }
  0xf0   : > { %1151 = vmatpush1.bf16.msra.mxu0 %v1911_v57  ;;  %1237 = vmatpush1.bf16.msra.mxu1 %v1914_v58 }
  0xf1   : > { %1152 = vmatprep.subr.bf16.mxu0 %v1919_v59  ;;  %1238 = vmatprep.subr.bf16.mxu1 %v1922_v60 }
  0xf4   : > { %1153 = vmatpush1.bf16.msra.mxu0 %v1917_v61  ;;  %1239 = vmatpush1.bf16.msra.mxu1 %v1920_v62 }
  0xf5   : > { %1154 = vmatprep.subr.bf16.mxu0 %v1925_v63  ;;  %1240 = vmatprep.subr.bf16.mxu1 %v1928_v0 }
  0xf8   : > { %1155 = vmatpush1.bf16.msra.mxu0 %v1923_v1  ;;  %1241 = vmatpush1.bf16.msra.mxu1 %v1926_v2 }
  0xfb   : > { %1157 = vmatmul.mubr.bf16.vlgmr.msra.gmra.mrb[0].mxu0 %v1929_v3  ;;  %1243 = vmatmul.mubr.bf16.vlgmr.msra.gmra.mrb[0].mxu1 %v1929_v3 }
 0x1ce   : > { %v1158_v15 = vpop.f32.mrb[0].mxu0  ;;  %v1244_v16 = vpop.f32.mrb[0].mxu1 }
 0x1cf   : > { %v1302_v17 = vadd.f32 %v1285_v11, %v1158_v15  ;;  %v1304_v18 = vadd.f32 %v1293_v12, %v1244_v16  ;;  %v1160_v19 = vpop.f32.mrb[1].mxu0  ;;  %v1246_v20 = vpop.f32.mrb[1].mxu1 }
 0x1d0   : > { %v1303_v21 = vadd.f32 %v1289_v13, %v1160_v19  ;;  %v1305_v22 = vadd.f32 %v1297_v14, %v1246_v20  ;;  %v1162_v23 = vpop.f32.mrb[2].mxu0  ;;  %v1248_v24 = vpop.f32.mrb[2].mxu1 }
 0x1d1   : > { %v1310_v25 = vmax.f32 %v1302_v17, 0.0  ;;  %v1312_v26 = vmax.f32 %v1304_v18, 0.0  ;;  %v1306_v27 = vadd.f32 %v1285_v11, %v1162_v23  ;;  %v1308_v28 = vadd.f32 %v1293_v12, %v1248_v24  ;;  %v1164_v29 = vpop.f32.mrb[3].mxu0  ;;  %v1250_v30 = vpop.f32.mrb[3].mxu1 }
 0x1d2   : > { %v1311_v31 = vmax.f32 %v1303_v21, 0.0  ;;  %v1313_v32 = vmax.f32 %v1305_v22, 0.0  ;;  %v1307_v33 = vadd.f32 %v1289_v13, %v1164_v29  ;;  %v1309_v34 = vadd.f32 %v1297_v14, %v1250_v30 }
 0x1d3   : > { %v1314_v35 = vmax.f32 %v1306_v27, 0.0  ;;  %v1316_v36 = vmax.f32 %v1308_v28, 0.0 }
 0x1d4   : > { %v1637_v37 = vpack.c.bf16 %v1311_v31, %v1310_v25  ;;  %v1638_v38 = vpack.c.bf16 %v1313_v32, %v1312_v26  ;;  %v1315_v39 = vmax.f32 %v1307_v33, 0.0  ;;  %v1317_v40 = vmax.f32 %v1309_v34, 0.0 }
 0x1d6   : > { %1342 = vst [vmem:[%s263_s19] sm:$0xff] %v1637_v37  ;;  %1343 = vst [vmem:[%s263_s19 + $0x8] sm:$0xff] %v1638_v38  ;;  %v1639_v41 = vpack.c.bf16 %v1315_v39, %v1314_v35  ;;  %v1640_v42 = vpack.c.bf16 %v1317_v40, %v1316_v36 }
 0x1d8   : > { %1344 = vst [vmem:[%s263_s19 + $0x10] sm:$0xff] %v1639_v41  ;;  %1345 = vst [vmem:[%s263_s19 + $0x18] sm:$0xff] %v1640_v42 }
 0x1d9   : > { %2033 = shalt.err (!%p2030_p2)
}
 0x1da   : > { %s2034_s7 = scalar_lea.hbm %s2482_s5, 512  ;;  %s2038_s28 = scalar_lea.hbm %s2533_s3, 1536 }
 0x1db   : > { %p2035_p5 = scmp.ne.s32.totalorder %s2482_s5, %s2034_s7  ;;  %p2039_p4 = scmp.lt.u32.totalorder %s2482_s5, %s2533_s3 }
 0x1dc   : > { %p2040_p7 = scmp.lt.u32.totalorder %s2038_s28, %s2034_s7  ;;  %p2042_p9 = scmp.lt.u32.totalorder %s2034_s7, %s2482_s5 }
 0x1dd   : > { %p2036_p11 = pnand %p2035_p5, %p2557_p12 }
 0x1de   : > { %p2041_p0 = por %p2040_p7, %p2039_p4 }
 0x1df   : > { %p2037_p8 = pneg %p2036_p11 }
 0x1e0   : > { %p2043_p13 = por %p2042_p9, %p2041_p0 }
 0x1e2   : > { %p2044_p6 = pnand %p2043_p13, %p2037_p8 }
 0x1e4   : > { %2047 = shalt.err (!%p2044_p6)
}
 0x1e5   : > { %s2115_s10 = smov 256   ;;  %s2116_s19 = smov 768  }
 0x1e6   : > { %s2117_s22 = smov 16  }
 0x1e7   : > { %1658 = dma.vmem_to_hbm [thread:$0]  (%p2557_p12), %s2477_s11, 512, %s2482_s5, %s1347_s15, %s2115_s10, %s2116_s19, %s2117_s22  }
 0x1e8 PF: > { %p1678_p3 = scmp.ge.s32.totalorder %s2106_s17, 2  ;;  %s1375_s9 = sand.u32 1, %s2086_s12  }
 0x1e9   : > { %p2558_p1 = scmp.ne.s32.totalorder %s2547_s4, 0  ;;  %s1376_s23 = scalar_lea.sflag [#allocation5], %s1375_s9 }
 0x1eb   : > { %p1672_p10 = pnand %p1678_p3, %p2558_p1 }
 0x1ed   : > { %2081 = dma.done.wait (!%p1672_p10), %s1376_s23, 512  }
 0x1ee   : > { %2083 = vsyncadd (!%p1672_p10), %s1376_s23, 4294966784  ;;  %s20_s17 = sadd.s32 1, %s2106_s17   ;;  %s2559_s12 = smov %s2090_s13 }
 0x1ef   : > { %p17_p2 = scmp.ge.s32.totalorder %s20_s17, 5   ;;  %s2560_s13 = smov %s2094_s14 }
 0x1f0   : > { %s2561_s14 = smov %s2188_s24  ;;  %s2562_s15 = smov %s2102_s16 }
 0x1f1   : > { %s2563_s16 = smov %s2565_s18  ;;  %19 = sbr.rel (!%p17_p2) target bundleno = 9 (0x9), region = 102 }
 0x1f8   :  { %1381 = vsyncpa [#allocation4], 1 }
 0x1f9   :  { %1383 = vsyncpa [#allocation4 + $0x1], 1 }
 0x1fa   :  { %1384 = vsyncpa [#allocation7], 1 }
 0x1fb   :  { %1386 = vsyncpa [#allocation7 + $0x1], 1 }
 0x1fc   :  { %1387 = vsyncpa [#allocation5], 1 }
 0x1fd   :  { %1389 = vsyncpa [#allocation5 + $0x1], 1 }

</bundles_post_ra>
